<compile_context>
chip_gen: v6e
topology: v6e:2x2x1
jax: 0.10.0
libtpu: 0.0.40
codegen_flags: <defaults>
</compile_context>

<pallas_src>
import functools

import jax
import jax.numpy as jnp
from jax import lax
from jax.experimental import pallas as pl
from jax.experimental.pallas import tpu as pltpu


_CONTRACT_LAST = (((1,), (1,)), ((), ()))   # contract last dim of both operands


# ----------------------------------------------------------------------------
# Helpers
# ----------------------------------------------------------------------------
def _round_up(x, m):
    return ((x + m - 1) // m) * m


def _cdiv(a, b):
    return -(-a // b)


def _pad2(a, rows, cols):
    a = jnp.asarray(a)
    if a.ndim == 1:
        a = a.reshape(1, -1)
    pr, pc = rows - a.shape[0], cols - a.shape[1]
    if pr or pc:
        a = jnp.pad(a, ((0, pr), (0, pc)))
    return a


def _vmem_budget_bytes():
    # ~75% of physical VMEM (128 MiB v5e/v6e, 64 MiB per-TC v7x); conservative
    # fallback if the query is unavailable.
    try:
        cap = int(pltpu.get_tpu_info().vmem_capacity_bytes)
    except Exception:
        cap = 64 * 1024 * 1024
    return max(32 * 1024 * 1024, (cap * 3) // 4)


# ----------------------------------------------------------------------------
# Fused kernels (weights fully VMEM-resident; grid over batch tiles only)
# ----------------------------------------------------------------------------
def _fused_train_kernel(x_ref, we_ref, be_ref, wd_ref, bd_ref, rec_ref):
    # encoder: [tm, I] x [H, I] -> [tm, H]   (beta already folded into We/be)
    e = lax.dot_general(x_ref[...], we_ref[...], _CONTRACT_LAST,
                        preferred_element_type=jnp.float32)
    code = jnp.tanh(e + be_ref[...])
    # decoder: [tm, H] x [I, H] -> [tm, I]   (1/beta already folded into Wd)
    rec = lax.dot_general(code.astype(wd_ref.dtype), wd_ref[...],
                          _CONTRACT_LAST, preferred_element_type=jnp.float32)
    rec_ref[...] = rec + bd_ref[...]


def _fused_eval_kernel(x_ref, we_ref, be_ref, code_ref):
    e = lax.dot_general(x_ref[...], we_ref[...], _CONTRACT_LAST,
                        preferred_element_type=jnp.float32)
    code_ref[...] = ((e + be_ref[...]) > 0.0).astype(jnp.uint8)


# ----------------------------------------------------------------------------
# Tiled two-pass kernels (bounded VMEM; no block spans the full padded I)
# ----------------------------------------------------------------------------
def _encode_kernel(x_ref, we_ref, be_ref, code_ref, acc_ref, *, training):
    # grid = (m, h, k) ; k (contraction over I) is the innermost "arbitrary"
    # axis — the (tm, th) f32 scratch accumulates over it.
    k = pl.program_id(2)

    @pl.when(k == 0)
    def _():
        acc_ref[...] = jnp.zeros_like(acc_ref)

    acc_ref[...] += lax.dot_general(x_ref[...], we_ref[...], _CONTRACT_LAST,
                                    preferred_element_type=jnp.float32)

    @pl.when(k == pl.num_programs(2) - 1)
    def _():
        e = acc_ref[...] + be_ref[...]
        if training:
            code_ref[...] = jnp.tanh(e).astype(code_ref.dtype)
        else:
            code_ref[...] = (e > 0.0).astype(jnp.uint8)


def _decode_kernel(code_ref, wd_ref, bd_ref, rec_ref):
    # grid = (m, n, k) ; k (contraction over H) is the innermost "arbitrary"
    # axis.  rec_ref's block index is constant over k, so it is VMEM-resident:
    # accumulate straight into the f32 output block (no extra scratch, and the
    # single `+=` lets Mosaic use MRB in-place accumulation on v7x).
    k = pl.program_id(2)

    @pl.when(k == 0)
    def _():
        rec_ref[...] = jnp.zeros_like(rec_ref)

    rec_ref[...] += lax.dot_general(code_ref[...], wd_ref[...], _CONTRACT_LAST,
                                    preferred_element_type=jnp.float32)

    @pl.when(k == pl.num_programs(2) - 1)
    def _():
        rec_ref[...] += bd_ref[...]


# ----------------------------------------------------------------------------
# Parameter preparation (do ONCE, reuse across forward calls)
# ----------------------------------------------------------------------------
def prepare_linear_ae_params(params, *, beta=1.0, compute_dtype=jnp.bfloat16):
    """Pad, cast and beta-fold the LinearAE weights once.

    We' = beta*We, be' = beta*be  =>  e' = beta*e   (used by both modes)
    Wd' = Wd/beta                 =>  rec = tanh(e') @ Wd'.T + bd
    """
    beta = float(beta)
    if beta == 0.0:
        # tanh(0*e)/0 is undefined in the original module as well.
        raise ValueError("LinearAE requires beta != 0")

    we = jnp.asarray(params["we"], jnp.float32)
    be = jnp.asarray(params["be"], jnp.float32).reshape(1, -1)
    wd = jnp.asarray(params["wd"], jnp.float32)
    bd = jnp.asarray(params["bd"], jnp.float32).reshape(1, -1)
    hidden_size, input_size = we.shape

    I = _round_up(input_size, 256)    # 256-wide MXU alignment (v6e/v7x)
    H = _round_up(hidden_size, 256)

    cd = jnp.dtype(compute_dtype)
    return dict(
        we=_pad2(we * beta, H, I).astype(cd),
        be=_pad2(be * beta, 1, H).astype(jnp.float32),
        wd=_pad2(wd / beta, I, H).astype(cd),
        bd=_pad2(bd, 1, I).astype(jnp.float32),
        input_size=input_size, hidden_size=hidden_size,
        padded_input=I, padded_hidden=H,
        beta=beta, compute_dtype=cd,
    )


# ----------------------------------------------------------------------------
# Forward
# ----------------------------------------------------------------------------
def linear_ae_forward(x, prepared, *, training=True, force_tiled=False):
    """LinearAE forward.  `prepared` comes from prepare_linear_ae_params."""
    batch = x.shape[0]
    in_sz, hid_sz = prepared["input_size"], prepared["hidden_size"]
    I, H = prepared["padded_input"], prepared["padded_hidden"]
    cd = prepared["compute_dtype"]
    cd_size = cd.itemsize
    budget = _vmem_budget_bytes()

    # --- batch tile: guarantee >=2 "parallel" tiles (megacore) when possible
    if batch >= 64:
        tm = min(512, _round_up(_cdiv(batch, 2), 32))
    else:
        tm = _round_up(max(batch, 1), 32)
    B = _round_up(batch, tm)
    gm = B // tm

    xw = _pad2(x, B, I).astype(cd)
    we, be = prepared["we"], prepared["be"]
    cparams = dict(vmem_limit_bytes=int(budget))

    # --- estimated VMEM footprint of the fused path (2x = double-buffering) --
    if training:
        fused_bytes = (4 * H * I * cd_size               # We + Wd
                       + 2 * tm * I * (cd_size + 4)      # x + rec blocks
                       + 2 * tm * H * (cd_size + 4)      # e / code temporaries
                       + 8 * (H + I))                    # biases
    else:
        fused_bytes = (2 * H * I * cd_size
                       + 2 * tm * I * cd_size
                       + 2 * tm * H * 5
                       + 8 * H)

    # ------------------------------------------------------------------ fused
    if (not force_tiled) and fused_bytes <= budget:
        if training:
            wd, bd = prepared["wd"], prepared["bd"]
            rec = pl.pallas_call(
                _fused_train_kernel,
                out_shape=jax.ShapeDtypeStruct((B, I), jnp.float32),
                grid_spec=pltpu.PrefetchScalarGridSpec(
                    num_scalar_prefetch=0, grid=(gm,),
                    in_specs=[
                        pl.BlockSpec((tm, I), lambda m: (m, 0)),   # x
                        pl.BlockSpec((H, I), lambda m: (0, 0)),    # We (resident)
                        pl.BlockSpec((1, H), lambda m: (0, 0)),    # be
                        pl.BlockSpec((I, H), lambda m: (0, 0)),    # Wd (resident)
                        pl.BlockSpec((1, I), lambda m: (0, 0)),    # bd
                    ],
                    out_specs=pl.BlockSpec((tm, I), lambda m: (m, 0)),
                ),
                compiler_params=pltpu.CompilerParams(
                    dimension_semantics=("parallel",), **cparams),
            )(xw, we, be, wd, bd)
            return rec[:batch, :in_sz]

        code = pl.pallas_call(
            _fused_eval_kernel,
            out_shape=jax.ShapeDtypeStruct((B, H), jnp.uint8),
            grid_spec=pltpu.PrefetchScalarGridSpec(
                num_scalar_prefetch=0, grid=(gm,),
                in_specs=[
                    pl.BlockSpec((tm, I), lambda m: (m, 0)),       # x
                    pl.BlockSpec((H, I), lambda m: (0, 0)),        # We (resident)
                    pl.BlockSpec((1, H), lambda m: (0, 0)),        # be
                ],
                out_specs=pl.BlockSpec((tm, H), lambda m: (m, 0)),
            ),
            compiler_params=pltpu.CompilerParams(
                dimension_semantics=("parallel",), **cparams),
        )(xw, we, be)
        return code[:batch, :hid_sz]

    # ------------------------------------------------------------------ tiled
    # Tile sizes divide the 256-aligned padded dims; VMEM per kernel stays a
    # few MiB independent of input_size (fits v7x's 64 MiB budget).
    th = 512 if H % 512 == 0 else 256                           # hidden tile
    tk = next(t for t in (1024, 512, 256) if I % t == 0)        # I contraction
    tn = tk                                                     # decoder out tile

    code_dtype = cd if training else jnp.uint8
    code = pl.pallas_call(
        functools.partial(_encode_kernel, training=training),
        out_shape=jax.ShapeDtypeStruct((B, H), code_dtype),
        grid_spec=pltpu.PrefetchScalarGridSpec(
            num_scalar_prefetch=0, grid=(gm, H // th, I // tk),
            in_specs=[
                pl.BlockSpec((tm, tk), lambda m, h, k: (m, k)),   # x
                pl.BlockSpec((th, tk), lambda m, h, k: (h, k)),   # We
                pl.BlockSpec((1, th), lambda m, h, k: (0, h)),    # be
            ],
            out_specs=pl.BlockSpec((tm, th), lambda m, h, k: (m, h)),
            scratch_shapes=[pltpu.VMEM((tm, th), jnp.float32)],
        ),
        compiler_params=pltpu.CompilerParams(
            dimension_semantics=("parallel", "parallel", "arbitrary"),
            **cparams),
    )(xw, we, be)

    if not training:
        return code[:batch, :hid_sz]

    wd, bd = prepared["wd"], prepared["bd"]
    rec = pl.pallas_call(
        _decode_kernel,
        out_shape=jax.ShapeDtypeStruct((B, I), jnp.float32),
        grid_spec=pltpu.PrefetchScalarGridSpec(
            num_scalar_prefetch=0, grid=(gm, I // tn, H // th),
            in_specs=[
                pl.BlockSpec((tm, th), lambda m, n, k: (m, k)),   # code
                pl.BlockSpec((tn, th), lambda m, n, k: (n, k)),   # Wd
                pl.BlockSpec((1, tn), lambda m, n, k: (0, n)),    # bd
            ],
            out_specs=pl.BlockSpec((tm, tn), lambda m, n, k: (m, n)),
        ),
        compiler_params=pltpu.CompilerParams(
            dimension_semantics=("parallel", "parallel", "arbitrary"),
            **cparams),
    )(code, wd, bd)
    return rec[:batch, :in_sz]


# ----------------------------------------------------------------------------
# PyTorch-Linear-style init + pure-JAX reference (mirrors kernel dtypes)
# ----------------------------------------------------------------------------
def init_linear_ae_params(key, input_size, hidden_size):
    k1, k2, k3, k4 = jax.random.split(key, 4)
    be_b = 1.0 / jnp.sqrt(jnp.float32(input_size))
    bd_b = 1.0 / jnp.sqrt(jnp.float32(hidden_size))
    return {
        "we": jax.random.uniform(k1, (hidden_size, input_size), jnp.float32,
                                 -be_b, be_b),
        "be": jax.random.uniform(k2, (1, hidden_size), jnp.float32, -be_b, be_b),
        "wd": jax.random.uniform(k3, (input_size, hidden_size), jnp.float32,
                                 -bd_b, bd_b),
        "bd": jax.random.uniform(k4, (1, input_size), jnp.float32, -bd_b, bd_b),
    }


def _reference(x, params, *, beta, training, compute_dtype):
    cd = jnp.dtype(compute_dtype)
    we = (jnp.asarray(params["we"], jnp.float32) * beta).astype(cd)
    be = jnp.asarray(params["be"], jnp.float32).reshape(1, -1) * beta
    e = lax.dot_general(x.astype(cd), we, _CONTRACT_LAST,
                        preferred_element_type=jnp.float32) + be
    if not training:
        return (e > 0.0).astype(jnp.uint8)
    code = jnp.tanh(e).astype(cd)
    wd = (jnp.asarray(params["wd"], jnp.float32) / beta).astype(cd)
    bd = jnp.asarray(params["bd"], jnp.float32).reshape(1, -1)
    return lax.dot_general(code, wd, _CONTRACT_LAST,
                           preferred_element_type=jnp.float32) + bd


if __name__ == "__main__":
    key = jax.random.PRNGKey(0)
    kx, kp, kx2, kp2 = jax.random.split(key, 4)

    # ---- small model: exercises the fused, weights-resident path ------------
    batch, input_size, hidden_size = 8, 256, 128
    x = jax.random.normal(kx, (batch, input_size), jnp.float32)
    params = init_linear_ae_params(kp, input_size, hidden_size)

    prep_bf16 = prepare_linear_ae_params(params, beta=2.0,
                                         compute_dtype=jnp.bfloat16)
    rec = jax.block_until_ready(linear_ae_forward(x, prep_bf16, training=True))
    rec_ref = _reference(x, params, beta=2.0, training=True,
                         compute_dtype=jnp.bfloat16)
    assert rec.shape == (batch, input_size) and rec.dtype == jnp.float32
    assert jnp.allclose(rec, rec_ref, rtol=2e-2, atol=2e-2)

    prep_f32 = prepare_linear_ae_params(params, beta=1.0,
                                        compute_dtype=jnp.float32)
    code = jax.block_until_ready(linear_ae_forward(x, prep_f32, training=False))
    code_ref = _reference(x, params, beta=1.0, training=False,
                          compute_dtype=jnp.float32)
    assert code.shape == (batch, hidden_size) and code.dtype == jnp.uint8
    e_f32 = x @ params["we"].T + params["be"].reshape(1, -1)
    mism = code != code_ref
    assert bool(jnp.all(~mism | (jnp.abs(e_f32) < 1e-3)))

    # ---- larger model, forced through the tiled two-pass path ---------------
    # I pads to 768 (3 contraction tiles), H pads to 512, batch=72 -> two
    # "parallel" batch tiles (megacore on v7x).
    batch2, in2, hid2 = 72, 600, 260
    x2 = jax.random.normal(kx2, (batch2, in2), jnp.float32)
    params2 = init_linear_ae_params(kp2, in2, hid2)
    prep2 = prepare_linear_ae_params(params2, beta=1.0,
                                     compute_dtype=jnp.bfloat16)

    rec2 = jax.block_until_ready(
        linear_ae_forward(x2, prep2, training=True, force_tiled=True))
    rec2_ref = _reference(x2, params2, beta=1.0, training=True,
                          compute_dtype=jnp.bfloat16)
    assert rec2.shape == (batch2, in2) and rec2.dtype == jnp.float32
    assert jnp.allclose(rec2, rec2_ref, rtol=2e-2, atol=2e-2)

    code2 = jax.block_until_ready(
        linear_ae_forward(x2, prep2, training=False, force_tiled=True))
    code2_ref = _reference(x2, params2, beta=1.0, training=False,
                           compute_dtype=jnp.bfloat16)
    assert code2.shape == (batch2, hid2) and code2.dtype == jnp.uint8
    e2 = x2 @ params2["we"].T + params2["be"].reshape(1, -1)
    mism2 = code2 != code2_ref
    assert bool(jnp.all(~mism2 | (jnp.abs(e2) < 2e-2)))

    print("KERNEL_OK")
</pallas_src>

<mosaic_0001>
module attributes {stable_mosaic.version = 11 : i64} {
  func.func @_fused_train_kernel(%arg0: i32, %arg1: memref<32x256xbf16, #tpu.memory_space<vmem>>, %arg2: memref<256x256xbf16, #tpu.memory_space<vmem>>, %arg3: memref<1x256xf32, #tpu.memory_space<vmem>>, %arg4: memref<256x256xbf16, #tpu.memory_space<vmem>>, %arg5: memref<1x256xf32, #tpu.memory_space<vmem>>, %arg6: memref<32x256xf32, #tpu.memory_space<vmem>>) attributes {dimension_semantics = [#tpu.dimension_semantics<parallel>], iteration_bounds = array<i64: 1>, scalar_prefetch = 0 : i64, scratch_operands = 0 : i64, tpu.core_type = #tpu.core_type<tc>, window_params = [{transform_indices = @transform_0, window_bounds = array<i64: 32, 256>}, {pipeline_mode = #tpu.pipeline_mode<synchronous>, transform_indices = @transform_1, window_bounds = array<i64: 256, 256>}, {pipeline_mode = #tpu.pipeline_mode<synchronous>, transform_indices = @transform_2, window_bounds = array<i64: 1, 256>}, {pipeline_mode = #tpu.pipeline_mode<synchronous>, transform_indices = @transform_3, window_bounds = array<i64: 256, 256>}, {pipeline_mode = #tpu.pipeline_mode<synchronous>, transform_indices = @transform_4, window_bounds = array<i64: 1, 256>}, {transform_indices = @transform_5, window_bounds = array<i64: 32, 256>}]} {
    %c0 = arith.constant 0 : index
    %c0_0 = arith.constant 0 : index
    %0 = vector.load %arg1[%c0, %c0_0] : memref<32x256xbf16, #tpu.memory_space<vmem>>, vector<32x256xbf16>
    %c0_1 = arith.constant 0 : index
    %c0_2 = arith.constant 0 : index
    %1 = vector.load %arg2[%c0_1, %c0_2] : memref<256x256xbf16, #tpu.memory_space<vmem>>, vector<256x256xbf16>
    %cst = arith.constant dense<0.000000e+00> : vector<32x256xf32>
    %2 = tpu.matmul %0, %1, %cst {dimension_numbers = #tpu.dot_dimension_numbers<[1], [1], [0], [0], [0, 0, 1, 0], [], []>} : vector<32x256xbf16>, vector<256x256xbf16>, vector<32x256xf32> -> vector<32x256xf32>
    %c0_3 = arith.constant 0 : index
    %c0_4 = arith.constant 0 : index
    %3 = vector.load %arg3[%c0_3, %c0_4] : memref<1x256xf32, #tpu.memory_space<vmem>>, vector<1x256xf32>
    %4 = vector.broadcast %3 : vector<1x256xf32> to vector<32x256xf32>
    %5 = arith.addf %2, %4 : vector<32x256xf32>
    %6 = math.tanh %5 : vector<32x256xf32>
    %7 = arith.truncf %6 : vector<32x256xf32> to vector<32x256xbf16>
    %c0_5 = arith.constant 0 : index
    %c0_6 = arith.constant 0 : index
    %8 = vector.load %arg4[%c0_5, %c0_6] : memref<256x256xbf16, #tpu.memory_space<vmem>>, vector<256x256xbf16>
    %cst_7 = arith.constant dense<0.000000e+00> : vector<32x256xf32>
    %9 = tpu.matmul %7, %8, %cst_7 {dimension_numbers = #tpu.dot_dimension_numbers<[1], [1], [0], [0], [0, 0, 1, 0], [], []>} : vector<32x256xbf16>, vector<256x256xbf16>, vector<32x256xf32> -> vector<32x256xf32>
    %c0_8 = arith.constant 0 : index
    %c0_9 = arith.constant 0 : index
    %10 = vector.load %arg5[%c0_8, %c0_9] : memref<1x256xf32, #tpu.memory_space<vmem>>, vector<1x256xf32>
    %11 = vector.broadcast %10 : vector<1x256xf32> to vector<32x256xf32>
    %12 = arith.addf %9, %11 : vector<32x256xf32>
    %c0_10 = arith.constant 0 : index
    %c0_11 = arith.constant 0 : index
    %13 = vector.load %arg6[%c0_10, %c0_11] : memref<32x256xf32, #tpu.memory_space<vmem>>, vector<32x256xf32>
    tpu.vector_store %arg6[%c0_10, %c0_11], %12 {strides = array<i32>} : memref<32x256xf32, #tpu.memory_space<vmem>>, vector<32x256xf32>,
    return
  }
  func.func @transform_0(%arg0: i32) -> (i32, i32) {
    %c0_i32 = arith.constant 0 : i32
    %c0_i32_0 = arith.constant 0 : i32
    return %arg0, %c0_i32 : i32, i32
  }
  func.func @transform_1(%arg0: i32) -> (i32, i32) {
    %c0_i32 = arith.constant 0 : i32
    %c0_i32_0 = arith.constant 0 : i32
    %c0_i32_1 = arith.constant 0 : i32
    return %c0_i32, %c0_i32_0 : i32, i32
  }
  func.func @transform_2(%arg0: i32) -> (i32, i32) {
    %c0_i32 = arith.constant 0 : i32
    %c0_i32_0 = arith.constant 0 : i32
    %c0_i32_1 = arith.constant 0 : i32
    return %c0_i32, %c0_i32_0 : i32, i32
  }
  func.func @transform_3(%arg0: i32) -> (i32, i32) {
    %c0_i32 = arith.constant 0 : i32
    %c0_i32_0 = arith.constant 0 : i32
    %c0_i32_1 = arith.constant 0 : i32
    return %c0_i32, %c0_i32_0 : i32, i32
  }
  func.func @transform_4(%arg0: i32) -> (i32, i32) {
    %c0_i32 = arith.constant 0 : i32
    %c0_i32_0 = arith.constant 0 : i32
    %c0_i32_1 = arith.constant 0 : i32
    return %c0_i32, %c0_i32_0 : i32, i32
  }
  func.func @transform_5(%arg0: i32) -> (i32, i32) {
    %c0_i32 = arith.constant 0 : i32
    %c0_i32_0 = arith.constant 0 : i32
    return %arg0, %c0_i32 : i32, i32
  }
}

</mosaic_0001>

<bundles_post_ra>
// kernel: tpu_custom_call.1
= control target key start
LH: loop header
LB: loop body
LE: loop exit
PB: predicated region body
PF: predicated region fallthrough
CT: control target
= control target key end

     0   :  { %10 = vsyncpa [#allocation3], 0  ;;  %s974_s0 = inlined_call_operand.hbm [shape: bf16[32,256], index: 0, kind: input, shape index: {}]   ;;  %s975_s1 = inlined_call_operand.hbm [shape: bf16[256,256], index: 1, kind: input, shape index: {}]   ;;  %s976_s2 = inlined_call_operand.vmem [shape: f32[1,256], index: 2, kind: input, shape index: {}]   ;;  %s977_s3 = inlined_call_operand.hbm [shape: bf16[256,256], index: 3, kind: input, shape index: {}]   ;;  %s978_s4 = inlined_call_operand.vmem [shape: f32[1,256], index: 4, kind: input, shape index: {}]   ;;  %s979_s5 = inlined_call_operand.hbm [shape: f32[32,256], index: 5, kind: output, shape index: {}]  }
   0x1   :  { %11 = vsyncpa [#allocation6], 0 }
   0x2   :  { %12 = vsyncpa [#allocation4], 0  ;;  %s918_s18 = smov [#allocation5]   ;;  %s919_s20 = smov [#allocation2]  }
   0x3   :  { %s30_s19 = sshll.u32 %s918_s18, 4  ;;  %s18_s21 = sshll.u32 %s919_s20, 4  ;;  %s31_s19 = int_to_ptr.vmem [resolvable:$true] %s30_s19  ;;  %s19_s21 = int_to_ptr.vmem [resolvable:$true] %s18_s21 }
   0x4   :  { %s840_s22 = scalar_lea.vmem %s31_s19, 4096  ;;  %p845_p1 = scmp.lt.s32.totalorder %s31_s19, %s31_s19 }
   0x5   :  { %p841_p0 = scmp.ne.s32.totalorder %s31_s19, %s840_s22  ;;  %p846_p2 = scmp.lt.s32.totalorder %s840_s22, %s840_s22 }
   0x7   :  { %p847_p3 = por %p846_p2, %p845_p1 }
   0x9   :  { %p848_p4 = pnand %p847_p3, %p841_p0 }
   0xb   :  { %851 = shalt.err (!%p848_p4)
}
   0xc   :  { %s920_s23 = smov 128   ;;  %s921_s24 = smov 8  }
   0xd   :  { %36 = dma.hbm_to_vmem [thread:$0]  %s975_s1, 4096, %s31_s19, [#allocation6], %s920_s23, %s920_s23, %s921_s24  }
   0xe   :  { %s860_s27 = scalar_lea.vmem %s19_s21, 512  ;;  %p865_p6 = scmp.lt.s32.totalorder %s19_s21, %s19_s21 }
   0xf   :  { %p861_p5 = scmp.ne.s32.totalorder %s19_s21, %s860_s27  ;;  %p866_p7 = scmp.lt.s32.totalorder %s860_s27, %s860_s27 }
  0x11   :  { %p867_p8 = por %p866_p7, %p865_p6 }
  0x13   :  { %p868_p9 = pnand %p867_p8, %p861_p5 }
  0x15   :  { %871 = shalt.err (!%p868_p9)
}
  0x16   :  { %24 = dma.hbm_to_vmem [thread:$0]  %s974_s0, 512, %s19_s21, [#allocation3], %s920_s23, %s920_s23, %s921_s24  }
  0x17   :  { %s922_s30 = smov [#allocation7]  }
  0x18   :  { %s44_s6 = sshll.u32 %s922_s30, 4  ;;  %s45_s6 = int_to_ptr.vmem [resolvable:$true] %s44_s6 }
  0x19   :  { %s880_s7 = scalar_lea.vmem %s45_s6, 4096  ;;  %p885_p11 = scmp.lt.s32.totalorder %s45_s6, %s45_s6 }
  0x1a   :  { %p881_p10 = scmp.ne.s32.totalorder %s45_s6, %s880_s7  ;;  %p886_p12 = scmp.lt.s32.totalorder %s880_s7, %s880_s7 }
  0x1c   :  { %p887_p13 = por %p886_p12, %p885_p11 }
  0x1e   :  { %p888_p0 = pnand %p887_p13, %p881_p10 }
  0x20   :  { %891 = shalt.err (!%p888_p0)
}
  0x21   :  { %50 = dma.hbm_to_vmem [thread:$0]  %s977_s3, 4096, %s45_s6, [#allocation6], %s920_s23, %s920_s23, %s921_s24  }
  0x22   :  { %912 = dma.done.wait [#allocation3], 512  }
  0x23   :  { %913 = vsyncadd [#allocation3], 4294966784 }
  0x24   :  { %914 = dma.done.wait [#allocation6], 8192  }
  0x25   :  { %915 = vsyncadd [#allocation6], 4294959104  ;;  %v714_v0 = vld [vmem:[#allocation5 + $0x74] ss:$8 sps:$4 sm:$0xff]   ;;  %v716_v1 = vld [vmem:[#allocation5 + $0x70] ss:$8 sps:$4 sm:$0xff]  }
  0x26   :  { %290 = vmatprep.subr.bf16.mxu0 %v714_v0  ;;  %v717_v2 = vld [vmem:[#allocation5 + $0x64] ss:$8 sps:$4 sm:$0xff]   ;;  %v719_v3 = vld [vmem:[#allocation5 + $0x60] ss:$8 sps:$4 sm:$0xff]   ;;  %v720_v4 = vld [vmem:[#allocation5 + $0x54] ss:$8 sps:$4 sm:$0xff]  }
  0x27   :  { %291 = vmatpush1.bf16.xpose.msra.mxu0 %v716_v1  ;;  %v722_v5 = vld [vmem:[#allocation5 + $0x50] ss:$8 sps:$4 sm:$0xff]   ;;  %v723_v6 = vld [vmem:[#allocation5 + $0x44] ss:$8 sps:$4 sm:$0xff]   ;;  %v725_v8 = vld [vmem:[#allocation5 + $0x40] ss:$8 sps:$4 sm:$0xff]  }
  0x28   :  { %292 = vmatprep.subr.bf16.mxu0 %v717_v2  ;;  %v764_v7 = vld [vmem:[#allocation2 + $0x4] ss:$8 sps:$4 sm:$0xff]   ;;  %v726_v9 = vld [vmem:[#allocation5 + $0x34] ss:$8 sps:$4 sm:$0xff]   ;;  %v770_v11 = vld [vmem:[#allocation7 + $0x70] ss:$8 sps:$4 sm:$0xff]  }
  0x29   :  { %322 = vmatprep.mubr.bf16.mxu0 %v764_v7  ;;  %v768_v10 = vld [vmem:[#allocation7 + $0x74] ss:$8 sps:$4 sm:$0xff]   ;;  %v771_v12 = vld [vmem:[#allocation7 + $0x64] ss:$8 sps:$4 sm:$0xff]   ;;  %v728_v13 = vld [vmem:[#allocation5 + $0x30] ss:$8 sps:$4 sm:$0xff]  }
  0x2a   :  { %559 = vmatprep.subr.bf16.mxu1 %v768_v10  ;;  %v729_v14 = vld [vmem:[#allocation5 + $0x24] ss:$8 sps:$4 sm:$0xff]   ;;  %v773_v15 = vld [vmem:[#allocation7 + $0x60] ss:$8 sps:$4 sm:$0xff]   ;;  %v774_v16 = vld [vmem:[#allocation7 + $0x54] ss:$8 sps:$4 sm:$0xff]  }
  0x2b   :  { %560 = vmatpush1.bf16.xpose.msra.mxu1 %v770_v11  ;;  %v731_v17 = vld [vmem:[#allocation5 + $0x20] ss:$8 sps:$4 sm:$0xff]   ;;  %v732_v18 = vld [vmem:[#allocation5 + $0x14] ss:$8 sps:$4 sm:$0xff]   ;;  %v776_v19 = vld [vmem:[#allocation7 + $0x50] ss:$8 sps:$4 sm:$0xff]  }
  0x2c   :  { %561 = vmatprep.subr.bf16.mxu1 %v771_v12  ;;  %v777_v20 = vld [vmem:[#allocation7 + $0x44] ss:$8 sps:$4 sm:$0xff]   ;;  %v734_v21 = vld [vmem:[#allocation5 + $0x10] ss:$8 sps:$4 sm:$0xff]   ;;  %v779_v22 = vld [vmem:[#allocation7 + $0x40] ss:$8 sps:$4 sm:$0xff]  }
  0x2d   :  { %v735_v23 = vld [vmem:[#allocation5 + $0x4] ss:$8 sps:$4 sm:$0xff]   ;;  %v780_v24 = vld [vmem:[#allocation7 + $0x34] ss:$8 sps:$4 sm:$0xff]   ;;  %v737_v25 = vld [vmem:[#allocation5] ss:$8 sps:$4 sm:$0xff]  }
  0x2e   :  { %v782_v26 = vld [vmem:[#allocation7 + $0x30] ss:$8 sps:$4 sm:$0xff]   ;;  %v738_v27 = vld [vmem:[#allocation5 + $0xf4] ss:$8 sps:$4 sm:$0xff]   ;;  %v783_v28 = vld [vmem:[#allocation7 + $0x24] ss:$8 sps:$4 sm:$0xff]  }
  0x2f   :  { %293 = vmatpush1.bf16.xpose.msra.mxu0 %v719_v3  ;;  %v740_v29 = vld [vmem:[#allocation5 + $0xf0] ss:$8 sps:$4 sm:$0xff]   ;;  %v785_v30 = vld [vmem:[#allocation7 + $0x20] ss:$8 sps:$4 sm:$0xff]   ;;  %v741_v31 = vld [vmem:[#allocation5 + $0xe4] ss:$8 sps:$4 sm:$0xff]  }
  0x30   :  { %294 = vmatprep.subr.bf16.mxu0 %v720_v4  ;;  %v786_v32 = vld [vmem:[#allocation7 + $0x14] ss:$8 sps:$4 sm:$0xff]   ;;  %v743_v33 = vld [vmem:[#allocation5 + $0xe0] ss:$8 sps:$4 sm:$0xff]   ;;  %v788_v34 = vld [vmem:[#allocation7 + $0x10] ss:$8 sps:$4 sm:$0xff]   ;;  %v100_v4 = vlaneseq }
  0x31   :  { %v744_v35 = vld [vmem:[#allocation5 + $0xd4] ss:$8 sps:$4 sm:$0xff]   ;;  %v789_v36 = vld [vmem:[#allocation7 + $0x4] ss:$8 sps:$4 sm:$0xff]   ;;  %v746_v37 = vld [vmem:[#allocation5 + $0xd0] ss:$8 sps:$4 sm:$0xff]  }
  0x32   :  { %v791_v38 = vld [vmem:[#allocation7] ss:$8 sps:$4 sm:$0xff]   ;;  %v747_v39 = vld [vmem:[#allocation5 + $0xc4] ss:$8 sps:$4 sm:$0xff]   ;;  %v792_v40 = vld [vmem:[#allocation7 + $0xf4] ss:$8 sps:$4 sm:$0xff]  }
  0x33   :  { %562 = vmatpush1.bf16.xpose.msra.mxu1 %v773_v15  ;;  %v749_v41 = vld [vmem:[#allocation5 + $0xc0] ss:$8 sps:$4 sm:$0xff]   ;;  %v794_v42 = vld [vmem:[#allocation7 + $0xf0] ss:$8 sps:$4 sm:$0xff]   ;;  %v750_v43 = vld [vmem:[#allocation5 + $0xb4] ss:$8 sps:$4 sm:$0xff]  }
  0x34   :  { %563 = vmatprep.subr.bf16.mxu1 %v774_v16  ;;  %v795_v44 = vld [vmem:[#allocation7 + $0xe4] ss:$8 sps:$4 sm:$0xff]   ;;  %v752_v45 = vld [vmem:[#allocation5 + $0xb0] ss:$8 sps:$4 sm:$0xff]   ;;  %v797_v46 = vld [vmem:[#allocation7 + $0xe0] ss:$8 sps:$4 sm:$0xff]  }
  0x35   :  { %v753_v47 = vld [vmem:[#allocation5 + $0xa4] ss:$8 sps:$4 sm:$0xff]   ;;  %v798_v48 = vld [vmem:[#allocation7 + $0xd4] ss:$8 sps:$4 sm:$0xff]   ;;  %v755_v49 = vld [vmem:[#allocation5 + $0xa0] ss:$8 sps:$4 sm:$0xff]  }
  0x36   :  { %v800_v50 = vld [vmem:[#allocation7 + $0xd0] ss:$8 sps:$4 sm:$0xff]   ;;  %v756_v51 = vld [vmem:[#allocation5 + $0x94] ss:$8 sps:$4 sm:$0xff]   ;;  %v801_v52 = vld [vmem:[#allocation7 + $0xc4] ss:$8 sps:$4 sm:$0xff]  }
  0x37   :  { %295 = vmatpush1.bf16.xpose.msra.mxu0 %v722_v5  ;;  %v758_v53 = vld [vmem:[#allocation5 + $0x90] ss:$8 sps:$4 sm:$0xff]   ;;  %v803_v54 = vld [vmem:[#allocation7 + $0xc0] ss:$8 sps:$4 sm:$0xff]   ;;  %v759_v55 = vld [vmem:[#allocation5 + $0x84] ss:$8 sps:$4 sm:$0xff]  }
  0x38   :  { %296 = vmatprep.subr.bf16.mxu0 %v723_v6  ;;  %v804_v56 = vld [vmem:[#allocation7 + $0xb4] ss:$8 sps:$4 sm:$0xff]   ;;  %v761_v57 = vld [vmem:[#allocation5 + $0x80] ss:$8 sps:$4 sm:$0xff]   ;;  %v806_v58 = vld [vmem:[#allocation7 + $0xb0] ss:$8 sps:$4 sm:$0xff]  }
  0x39   :  { %v762_v59 = vld [vmem:[#allocation2] ss:$8 sps:$4 sm:$0xff]   ;;  %v765_v60 = vld [vmem:[#allocation2 + $0x14] ss:$8 sps:$4 sm:$0xff]   ;;  %v767_v61 = vld [vmem:[#allocation2 + $0x10] ss:$8 sps:$4 sm:$0xff]  }
  0x3a   :  { %v807_v62 = vld [vmem:[#allocation7 + $0xa4] ss:$8 sps:$4 sm:$0xff]   ;;  %v809_v63 = vld [vmem:[#allocation7 + $0xa0] ss:$8 sps:$4 sm:$0xff]   ;;  %v810_v0 = vld [vmem:[#allocation7 + $0x94] ss:$8 sps:$4 sm:$0xff]  }
  0x3b   :  { %564 = vmatpush1.bf16.xpose.msra.mxu1 %v776_v19  ;;  %v812_v1 = vld [vmem:[#allocation7 + $0x90] ss:$8 sps:$4 sm:$0xff]   ;;  %v813_v2 = vld [vmem:[#allocation7 + $0x84] ss:$8 sps:$4 sm:$0xff]   ;;  %v815_v3 = vld [vmem:[#allocation7 + $0x80] ss:$8 sps:$4 sm:$0xff]  }
  0x3c   :  { %565 = vmatprep.subr.bf16.mxu1 %v777_v20  ;;  %v101_v5 = vshrl.u32 %v100_v4, 7  ;;  %v98_v7 = vld [vmem:[%s976_s2] sm:$0x3] }
  0x3e   :  { %v106_v6 = vsub.s32 1, %v101_v5 }
  0x3f   :  { %297 = vmatpush1.bf16.xpose.msra.mxu0 %v725_v8  ;;  %v102_v8 = vsub.s32 0, %v101_v5 }
  0x40   :  { %298 = vmatprep.subr.bf16.mxu0 %v726_v9  ;;  %v107_v9 = vrot.slane %v98_v7, %v106_v6 }
  0x41   :  { %v103_v11 = vrot.slane %v98_v7, %v102_v8 }
  0x43   :  { %566 = vmatpush1.bf16.xpose.msra.mxu1 %v779_v22 }
  0x44   :  { %567 = vmatprep.subr.bf16.mxu1 %v780_v24 }
  0x47   :  { %299 = vmatpush1.bf16.xpose.msra.mxu0 %v728_v13 }
  0x48   :  { %300 = vmatprep.subr.bf16.mxu0 %v729_v14 }
  0x4b   :  { %568 = vmatpush1.bf16.xpose.msra.mxu1 %v782_v26 }
  0x4c   :  { %569 = vmatprep.subr.bf16.mxu1 %v783_v28 }
  0x4f   :  { %301 = vmatpush1.bf16.xpose.msra.mxu0 %v731_v17 }
  0x50   :  { %302 = vmatprep.subr.bf16.mxu0 %v732_v18 }
  0x53   :  { %570 = vmatpush1.bf16.xpose.msra.mxu1 %v785_v30 }
  0x54   :  { %571 = vmatprep.subr.bf16.mxu1 %v786_v32 }
  0x57   :  { %303 = vmatpush1.bf16.xpose.msra.mxu0 %v734_v21 }
  0x58   :  { %304 = vmatprep.subr.bf16.mxu0 %v735_v23 }
  0x5b   :  { %572 = vmatpush1.bf16.xpose.msra.mxu1 %v788_v34 }
  0x5c   :  { %573 = vmatprep.subr.bf16.mxu1 %v789_v36 }
  0x5f   :  { %305 = vmatpush1.bf16.xpose.msra.mxu0 %v737_v25 }
  0x60   :  { %306 = vmatprep.subr.bf16.mxu0 %v738_v27 }
  0x63   :  { %574 = vmatpush1.bf16.xpose.msra.mxu1 %v791_v38 }
  0x64   :  { %575 = vmatprep.subr.bf16.mxu1 %v792_v40 }
  0x67   :  { %307 = vmatpush2.bf16.xpose.msra.mxu0 %v740_v29 }
  0x68   :  { %308 = vmatprep.subr.bf16.mxu0 %v741_v31 }
  0x6b   :  { %576 = vmatpush2.bf16.xpose.msra.mxu1 %v794_v42 }
  0x6c   :  { %577 = vmatprep.subr.bf16.mxu1 %v795_v44 }
  0x6f   :  { %309 = vmatpush2.bf16.xpose.msra.mxu0 %v743_v33 }
  0x70   :  { %310 = vmatprep.subr.bf16.mxu0 %v744_v35 }
  0x73   :  { %578 = vmatpush2.bf16.xpose.msra.mxu1 %v797_v46 }
  0x74   :  { %579 = vmatprep.subr.bf16.mxu1 %v798_v48 }
  0x77   :  { %311 = vmatpush2.bf16.xpose.msra.mxu0 %v746_v37 }
  0x78   :  { %312 = vmatprep.subr.bf16.mxu0 %v747_v39  ;;  %v387_v39 = vld [vmem:[%s978_s4] sm:$0x3]  ;;  %s923_s4 = smov [#allocation8]  }
  0x79   :  { %v392_v40 = vrot.slane %v387_v39, %v102_v8  ;;  %s625_s10 = sshll.u32 %s923_s4, 4  ;;  %s626_s10 = int_to_ptr.vmem [resolvable:$true] %s625_s10 }
  0x7a   :  { %s892_s11 = scalar_lea.vmem %s626_s10, 1024  ;;  %p897_p2 = scmp.lt.s32.totalorder %s626_s10, %s626_s10 }
  0x7b   :  { %580 = vmatpush2.bf16.xpose.msra.mxu1 %v800_v50  ;;  %p893_p1 = scmp.ne.s32.totalorder %s626_s10, %s892_s11  ;;  %p898_p3 = scmp.lt.s32.totalorder %s892_s11, %s892_s11 }
  0x7c   :  { %581 = vmatprep.subr.bf16.mxu1 %v801_v52 }
  0x7d   :  { %p899_p4 = por %p898_p3, %p897_p2 }
  0x7f   :  { %313 = vmatpush2.bf16.xpose.msra.mxu0 %v749_v41  ;;  %v396_v41 = vrot.slane %v387_v39, %v106_v6  ;;  %p900_p5 = pnand %p899_p4, %p893_p1 }
  0x80   :  { %314 = vmatprep.subr.bf16.mxu0 %v750_v43 }
  0x83   :  { %582 = vmatpush2.bf16.xpose.msra.mxu1 %v803_v54 }
  0x84   :  { %583 = vmatprep.subr.bf16.mxu1 %v804_v56 }
  0x87   :  { %315 = vmatpush2.bf16.xpose.msra.mxu0 %v752_v45 }
  0x88   :  { %316 = vmatprep.subr.bf16.mxu0 %v753_v47 }
  0x8b   :  { %584 = vmatpush2.bf16.xpose.msra.mxu1 %v806_v58 }
  0x8c   :  { %585 = vmatprep.subr.bf16.mxu1 %v807_v62 }
  0x8f   :  { %317 = vmatpush2.bf16.xpose.msra.mxu0 %v755_v49 }
  0x90   :  { %318 = vmatprep.subr.bf16.mxu0 %v756_v51 }
  0x93   :  { %586 = vmatpush2.bf16.xpose.msra.mxu1 %v809_v63 }
  0x94   :  { %587 = vmatprep.subr.bf16.mxu1 %v810_v0 }
  0x97   :  { %319 = vmatpush2.bf16.xpose.msra.mxu0 %v758_v53 }
  0x98   :  { %320 = vmatprep.subr.bf16.mxu0 %v759_v55 }
  0x9b   :  { %588 = vmatpush2.bf16.xpose.msra.mxu1 %v812_v1 }
  0x9c   :  { %589 = vmatprep.subr.bf16.mxu1 %v813_v2 }
  0x9f   :  { %321 = vmatpush2.bf16.xpose.msra.mxu0 %v761_v57 }
  0xa3   :  { %590 = vmatpush2.bf16.xpose.msra.mxu1 %v815_v3 }
  0xa6   :  { %323 = vmatmul.mubr.bf16.vlgmr.msra.gmra.mxu0 %v762_v59 }
  0xa7   :  { %332 = vmatprep.mubr.bf16.mxu0 %v765_v60 }
  0xae   :  { %333 = vmatmul.mubr.bf16.gmra.mxu0 %v767_v61 }
 0x166   :  { %v324_v10 = vpop.f32.mrf.mxu0 }
 0x167   :  { %v325_v16 = vadd.f32 %v324_v10, %v103_v11 }
 0x168   :  { %v326_v12 = vpop.f32.mrf.mxu0 }
 0x169   :  { %v327_v13 = vadd.f32 %v326_v12, %v107_v9 }
 0x16a   :  { %v328_v14 = vpop.f32.mrf.mxu0 }
 0x16b   :  { %v329_v15 = vadd.f32 %v328_v14, %v103_v11  ;;  %816 = vtanh.f32 %v327_v13 }
 0x16c   :  { %v330_v17 = vpop.f32.mrf.mxu0 }
 0x16d   :  { %v331_v18 = vadd.f32 %v330_v17, %v107_v9  ;;  %818 = vtanh.f32 %v329_v15 }
 0x16e   :  { %v334_v19 = vpop.f32.mrf.mxu0 }
 0x16f   :  { %820 = vtanh.f32 %v331_v18  ;;  %v335_v24 = vadd.f32 %v334_v19, %v103_v11 }
 0x170   :  { %822 = vtanh.f32 %v325_v16  ;;  %v336_v20 = vpop.f32.mrf.mxu0 }
 0x171   :  { %v337_v21 = vadd.f32 %v336_v20, %v107_v9 }
 0x172   :  { %v338_v22 = vpop.f32.mrf.mxu0 }
 0x173   :  { %v339_v23 = vadd.f32 %v338_v22, %v103_v11  ;;  %824 = vtanh.f32 %v337_v21 }
 0x174   :  { %v340_v25 = vpop.f32.mrf.mxu0 }
 0x175   :  { %v341_v26 = vadd.f32 %v340_v25, %v107_v9  ;;  %826 = vtanh.f32 %v339_v23 }
 0x177   :  { %828 = vtanh.f32 %v341_v26 }
 0x178   :  { %830 = vtanh.f32 %v335_v24  ;;  %v817_v27 = vpop.eup %816 }
 0x17a   :  { %v819_v28 = vpop.eup %818 }
 0x17c   :  { %v821_v29 = vpop.eup %820 }
 0x17d   :  { %v823_v30 = vpop.eup %822  ;;  %v352_v31 = vpack.c.bf16 %v821_v29, %v817_v27 }
 0x17e   :  { %v351_v32 = vpack.c.bf16 %v819_v28, %v823_v30 }
 0x17f   :  { %591 = vmatprep.mubr.bf16.mxu1 %v352_v31 }
 0x180   :  { %592 = vmatmul.mubr.bf16.vlgmr.msra.gmra.mxu1 %v351_v32  ;;  %v825_v33 = vpop.eup %824 }
 0x182   :  { %v827_v34 = vpop.eup %826 }
 0x184   :  { %v829_v35 = vpop.eup %828 }
 0x185   :  { %v831_v36 = vpop.eup %830  ;;  %v354_v37 = vpack.c.bf16 %v829_v35, %v825_v33 }
 0x186   :  { %v353_v38 = vpack.c.bf16 %v827_v34, %v831_v36 }
 0x187   :  { %601 = vmatprep.mubr.bf16.mxu1 %v354_v37 }
 0x188   :  { %602 = vmatmul.mubr.bf16.gmra.mxu1 %v353_v38 }
 0x240   :  { %v593_v42 = vpop.f32.mrf.mxu1 }
 0x241   :  { %v594_v43 = vadd.f32 %v593_v42, %v392_v40 }
 0x242   :  { %v595_v44 = vpop.f32.mrf.mxu1 }
 0x243   :  { %612 = vst [vmem:[#allocation8] sm:$0xff] %v594_v43  ;;  %v596_v45 = vadd.f32 %v595_v44, %v396_v41 }
 0x244   :  { %v597_v46 = vpop.f32.mrf.mxu1 }
 0x245   :  { %613 = vst [vmem:[#allocation8 + $0x8] sm:$0xff] %v596_v45  ;;  %v598_v47 = vadd.f32 %v597_v46, %v392_v40 }
 0x246   :  { %v599_v48 = vpop.f32.mrf.mxu1 }
 0x247   :  { %614 = vst [vmem:[#allocation8 + $0x10] sm:$0xff] %v598_v47  ;;  %v600_v49 = vadd.f32 %v599_v48, %v396_v41 }
 0x248   :  { %v603_v50 = vpop.f32.mrf.mxu1 }
 0x249   :  { %615 = vst [vmem:[#allocation8 + $0x18] sm:$0xff] %v600_v49  ;;  %v604_v51 = vadd.f32 %v603_v50, %v392_v40 }
 0x24a   :  { %v605_v52 = vpop.f32.mrf.mxu1 }
 0x24b   :  { %616 = vst [vmem:[#allocation8 + $0x20] sm:$0xff] %v604_v51  ;;  %v606_v53 = vadd.f32 %v605_v52, %v396_v41 }
 0x24c   :  { %v607_v54 = vpop.f32.mrf.mxu1 }
 0x24d   :  { %617 = vst [vmem:[#allocation8 + $0x28] sm:$0xff] %v606_v53  ;;  %v608_v55 = vadd.f32 %v607_v54, %v392_v40 }
 0x24e   :  { %v609_v56 = vpop.f32.mrf.mxu1 }
 0x24f   :  { %618 = vst [vmem:[#allocation8 + $0x30] sm:$0xff] %v608_v55  ;;  %v610_v57 = vadd.f32 %v609_v56, %v396_v41 }
 0x251   :  { %619 = vst [vmem:[#allocation8 + $0x38] sm:$0xff] %v610_v57 }
 0x252   :  { %903 = shalt.err (!%p900_p5)
}
 0x253   :  { %s924_s12 = smov 256   ;;  %s925_s13 = smov 16  }
 0x254   :  { %631 = dma.vmem_to_hbm [thread:$0]  %s626_s10, 1024, %s979_s5, [#allocation4], %s924_s12, %s924_s12, %s925_s13  }
 0x255   :  { %916 = dma.done.wait [#allocation4], 1024  }
 0x256   :  { %917 = vsyncadd [#allocation4], 4294966272 }
 0x257   :  { %635 = vsyncpa [#allocation3], 1 }
 0x258   :  { %636 = vsyncpa [#allocation6], 1 }
 0x259   :  { %637 = vsyncpa [#allocation4], 1 }

</bundles_post_ra>
